<compile_context>
chip_gen: v7x
topology: tpu7x:2x2x1
jax: 0.10.0
libtpu: 0.0.40
codegen_flags: <defaults>
</compile_context>

<pallas_src>
import jax
import jax.numpy as jnp
from jax import lax
from jax.experimental import pallas as pl
from jax.experimental.pallas import tpu as pltpu

MAX_WALK_LENGTH = 3  # matches module default


def _lpd_tile_kernel(a_ref, zt_ref, out_ref):
    """One (tm, tn) output tile:  sigmoid(A_i @ Zt_j).

    a_ref:   VMEM [tm, D]  rows of A = Z @ W for this tile's row block (f32)
    zt_ref:  VMEM [D, tn]  columns of Z^T for this tile's column block
    out_ref: VMEM [tm, tn] sigmoid(sparsified similarities) tile
    """
    s = lax.dot_general(
        a_ref[...],
        zt_ref[...].astype(a_ref.dtype),   # keep f32 accumulation path
        dimension_numbers=(((1,), (0,)), ((), ())),
        preferred_element_type=jnp.float32,
    )
    # sigmoid(x) = 0.5 * tanh(0.5 * x) + 0.5  -> single EUP transcendental
    # (avoids an exp + divide pair; matters on v7x where the f32 sink rate
    #  approaches EUP throughput).
    out_ref[...] = (0.5 * jnp.tanh(0.5 * s) + 0.5).astype(out_ref.dtype)


def _pick_tile(n, candidates, max_waste_frac=0.25):
    """Largest lane-aligned tile whose padding waste stays bounded."""
    n128 = pl.cdiv(n, 128) * 128
    for t in candidates:                       # descending
        if t <= n128:
            padded = pl.cdiv(n, t) * t
            if padded <= n128 * (1.0 + max_waste_frac):
                return t
    return 128


def locality_preserving_decoder(z, coefs, *,
                                z_compute_dtype=jnp.float32,
                                out_dtype=jnp.float32,
                                tm=None, tn=None):
    """z: [N, D] float32, coefs: [L] float32 -> [N, N] out_dtype."""
    n, d = z.shape
    num_walks = int(coefs.shape[0])

    # ---- tiny low-rank precompute (plain JAX; O(N*D^2 + L*D^3)) -------------
    zf = z.astype(jnp.float32)
    g = zf.T @ zf                                      # [D, D]
    w = coefs[0] * jnp.eye(d, dtype=jnp.float32)       # coef_1 * G^0
    gk = jnp.eye(d, dtype=jnp.float32)
    for k in range(1, num_walks):                      # static short loop
        gk = gk @ g
        w = w + coefs[k] * gk
    a = zf @ w                                         # [N, D] f32 (kept f32)
    zt = zf.T                                          # [D, N] canonical [K, N]

    # ---- tile selection first, then pad each output axis independently -----
    if tm is None:
        tm = _pick_tile(n, (512, 256, 128))
    if tn is None:
        tn = _pick_tile(n, (1024, 512, 256, 128))
    n_rows = pl.cdiv(n, tm) * tm
    n_cols = pl.cdiv(n, tn) * tn

    if n_rows != n:
        a = jnp.pad(a, ((0, n_rows - n), (0, 0)))
    if n_cols != n:
        zt = jnp.pad(zt, ((0, 0), (0, n_cols - n)))
    zt = zt.astype(z_compute_dtype)

    # Columns (j) are the inner (fastest) grid axis -> the A row block stays
    # resident in VMEM for a whole column sweep; only z_t tiles are re-fetched.
    grid = (n_rows // tm, n_cols // tn)

    out_itemsize = jnp.dtype(out_dtype).itemsize
    zt_itemsize = jnp.dtype(z_compute_dtype).itemsize
    out_bytes = n_rows * n_cols * out_itemsize
    a_bytes = n_rows * d * 4                            # each A block fetched once
    zt_bytes = grid[0] * n_cols * d * zt_itemsize       # z_t re-fetched per row block

    out = pl.pallas_call(
        _lpd_tile_kernel,
        out_shape=jax.ShapeDtypeStruct((n_rows, n_cols), out_dtype),
        grid=grid,
        in_specs=[
            pl.BlockSpec((tm, d), lambda i, j: (i, 0)),   # A row block   (varies with i)
            pl.BlockSpec((d, tn), lambda i, j: (0, j)),   # Z^T col block (varies with j)
        ],
        out_specs=pl.BlockSpec((tm, tn), lambda i, j: (i, j)),
        compiler_params=pltpu.CompilerParams(
            # Both output axes are independent -> sharded across TensorCores
            # on v7x; harmless on v5e/v6e.
            dimension_semantics=("parallel", "parallel"),
            # 2*(tm*tn*out) double-buffered + tm*tn f32 intermediate + tiny
            # inputs ~= 6-12 MiB for the default tiles: safe under 32 MiB on
            # every chip (v7x only has 64 MiB VMEM/TC).  On v5e/v6e this could
            # be raised to 64-96 MiB to buy even larger tiles.
            vmem_limit_bytes=32 * 1024 * 1024,
        ),
        cost_estimate=pl.CostEstimate(
            flops=2 * n_rows * n_cols * d,
            transcendentals=n_rows * n_cols,
            bytes_accessed=out_bytes + a_bytes + zt_bytes,
        ),
    )(a, zt)

    # Pad region evaluates to sigmoid(0)=0.5; the slice removes it.
    return out[:n, :n]


def _reference(z, coefs):
    """Pure-JAX reference matching the PyTorch forward (eval, p=0.0)."""
    s = z @ z.T
    acc = jnp.zeros_like(s)
    m = jnp.eye(z.shape[0], dtype=jnp.float32)
    for k in range(coefs.shape[0]):
        m = m @ s
        acc = acc + coefs[k] * m
    return jax.nn.sigmoid(acc)


if __name__ == "__main__":
    key = jax.random.PRNGKey(0)
    latent_dim = 32

    # Deterministic PGF coefficients: coef_k = 0.5 ** k for walk lengths 1..L.
    coefs = jnp.array([0.5 ** (k + 1) for k in range(MAX_WALK_LENGTH)],
                      dtype=jnp.float32)

    # Dropout p=0.0 / eval mode -> identity (nothing to do).
    # TODO(synk): training-mode dropout (p>0) would need pltpu.prng_random_bits masking.

    # ---- small case: N=64 (grid (1,1)) --------------------------------------
    z64 = jax.random.normal(key, (64, latent_dim), dtype=jnp.float32) * 0.1
    ref64 = _reference(z64, coefs)

    out_f32 = jax.block_until_ready(
        locality_preserving_decoder(z64, coefs, z_compute_dtype=jnp.float32))
    assert out_f32.shape == (64, 64)
    assert jnp.allclose(out_f32, ref64, atol=2e-4, rtol=2e-4)

    # bf16 Z operand (A stays f32), f32 accumulation + f32 output.
    out_zbf16 = jax.block_until_ready(
        locality_preserving_decoder(z64, coefs, z_compute_dtype=jnp.bfloat16))
    assert jnp.allclose(out_zbf16, ref64, atol=5e-3, rtol=5e-3)

    # bf16 output (halves writeback traffic for tolerant consumers).
    out_obf16 = jax.block_until_ready(
        locality_preserving_decoder(z64, coefs, out_dtype=jnp.bfloat16))
    assert out_obf16.dtype == jnp.bfloat16
    assert jnp.allclose(out_obf16.astype(jnp.float32), ref64, atol=1e-2, rtol=1e-2)

    # ---- non-multiple case: N=300 (exercises padding + multi-tile grid) ----
    z300 = jax.random.normal(jax.random.PRNGKey(1), (300, latent_dim),
                             dtype=jnp.float32) * 0.1
    ref300 = _reference(z300, coefs)
    out300 = jax.block_until_ready(
        locality_preserving_decoder(z300, coefs, z_compute_dtype=jnp.float32))
    assert out300.shape == (300, 300)
    assert jnp.allclose(out300, ref300, atol=2e-4, rtol=2e-4)

    print("KERNEL_OK")
</pallas_src>

<mosaic_0001>
module attributes {stable_mosaic.version = 11 : i64} {
  func.func @_lpd_tile_kernel(%arg0: i32, %arg1: i32, %arg2: memref<128x32xf32, #tpu.memory_space<vmem>>, %arg3: memref<32x128xf32, #tpu.memory_space<vmem>>, %arg4: memref<128x128xf32, #tpu.memory_space<vmem>>) attributes {dimension_semantics = [#tpu.dimension_semantics<parallel>, #tpu.dimension_semantics<parallel>], iteration_bounds = array<i64: 1, 1>, scalar_prefetch = 0 : i64, scratch_operands = 0 : i64, tpu.core_type = #tpu.core_type<tc>, window_params = [{transform_indices = @transform_0, window_bounds = array<i64: 128, 32>}, {transform_indices = @transform_1, window_bounds = array<i64: 32, 128>}, {transform_indices = @transform_2, window_bounds = array<i64: 128, 128>}]} {
    %c0 = arith.constant 0 : index
    %c0_0 = arith.constant 0 : index
    %0 = vector.load %arg2[%c0, %c0_0] : memref<128x32xf32, #tpu.memory_space<vmem>>, vector<128x32xf32>
    %c0_1 = arith.constant 0 : index
    %c0_2 = arith.constant 0 : index
    %1 = vector.load %arg3[%c0_1, %c0_2] : memref<32x128xf32, #tpu.memory_space<vmem>>, vector<32x128xf32>
    %cst = arith.constant dense<0.000000e+00> : vector<128x128xf32>
    %2 = tpu.matmul %0, %1, %cst {dimension_numbers = #tpu.dot_dimension_numbers<[1], [0], [0], [1], [0, 0, 1, 1], [], []>} : vector<128x32xf32>, vector<32x128xf32>, vector<128x128xf32> -> vector<128x128xf32>
    %cst_3 = arith.constant 5.000000e-01 : f32
    %3 = vector.broadcast %cst_3 : f32 to vector<128x128xf32>
    %4 = arith.mulf %3, %2 : vector<128x128xf32>
    %5 = math.tanh %4 : vector<128x128xf32>
    %cst_4 = arith.constant 5.000000e-01 : f32
    %6 = vector.broadcast %cst_4 : f32 to vector<128x128xf32>
    %7 = arith.mulf %6, %5 : vector<128x128xf32>
    %cst_5 = arith.constant 5.000000e-01 : f32
    %8 = vector.broadcast %cst_5 : f32 to vector<128x128xf32>
    %9 = arith.addf %7, %8 : vector<128x128xf32>
    %c0_6 = arith.constant 0 : index
    %c0_7 = arith.constant 0 : index
    %10 = vector.load %arg4[%c0_6, %c0_7] : memref<128x128xf32, #tpu.memory_space<vmem>>, vector<128x128xf32>
    tpu.vector_store %arg4[%c0_6, %c0_7], %9 {strides = array<i32>} : memref<128x128xf32, #tpu.memory_space<vmem>>, vector<128x128xf32>,
    return
  }
  func.func @transform_0(%arg0: i32, %arg1: i32) -> (i32, i32) {
    %c0_i32 = arith.constant 0 : i32
    %c0_i32_0 = arith.constant 0 : i32
    return %arg0, %c0_i32 : i32, i32
  }
  func.func @transform_1(%arg0: i32, %arg1: i32) -> (i32, i32) {
    %c0_i32 = arith.constant 0 : i32
    %c0_i32_0 = arith.constant 0 : i32
    return %c0_i32, %arg1 : i32, i32
  }
  func.func @transform_2(%arg0: i32, %arg1: i32) -> (i32, i32) {
    %c0_i32 = arith.constant 0 : i32
    return %arg0, %arg1 : i32, i32
  }
}

</mosaic_0001>

<bundles_post_ra>
// kernel: tpu_custom_call.1
= control target key start
LH: loop header
LB: loop body
LE: loop exit
PB: predicated region body
PF: predicated region fallthrough
CT: control target
= control target key end

     0   :  { %vm32_vm0 = vcmask 261120   ;;  %s567_s0 = inlined_call_operand.vmem [shape: f32[128,32], index: 0, kind: input, shape index: {}]   ;;  %s568_s1 = inlined_call_operand.vmem [shape: f32[32,128], index: 1, kind: input, shape index: {}]   ;;  %s569_s2 = inlined_call_operand.hbm [shape: f32[128,128], index: 2, kind: output, shape index: {}]  }
   0x1   :  { %v28_v0 = vld [vmem:[%s568_s1] sm:$0xff]  ;;  %v29_v1 = vld [vmem:[%s568_s1 + $0x8] sm:$0xff]  ;;  %v30_v2 = vld [vmem:[%s568_s1 + $0x10] sm:$0xff] }
   0x2   :  { %v390_v3 = vpack.c.bf16 %v29_v1, %v28_v0  ;;  %v31_v4 = vld [vmem:[%s568_s1 + $0x18] sm:$0xff]  ;;  %v12_v5 = vld [vmem:[%s567_s0] sm:$0xff] }
   0x3   :  { %v20_v6 = vld [vmem:[%s567_s0 + $0x40] sm:$0xff]  ;;  %v394_v7 = vpack.c.bf16 %v31_v4, %v30_v2  ;;  %366 = vmatprep.mubr.msk.f32.mxu0 %vm32_vm0, %v12_v5 }
   0x4   :  { %378 = vmatprep.mubr.msk.f32.mxu1 %vm32_vm0, %v20_v6  ;;  %391 = vmatprep.subr.bf16.mxu0 %v390_v3 }
   0x5   :  { %398 = vmatprep.subr.bf16.mxu1 %v390_v3  ;;  %393 = vmatpush3.bf16.msra.mxu0 %v390_v3 }
   0x6   :  { %400 = vmatpush3.bf16.msra.mxu1 %v390_v3  ;;  %395 = vmatprep.subr.bf16.mxu0 %v394_v7 }
   0x7   :  { %399 = vmatprep.subr.bf16.mxu1 %v394_v7 }
   0x8   :  { %7 = vsyncpa [#allocation3], 0  ;;  %v13_v8 = vld [vmem:[%s567_s0 + $0x8] sm:$0xff]  ;;  %v14_v10 = vld [vmem:[%s567_s0 + $0x10] sm:$0xff] }
   0x9   :  { %397 = vmatpush3.bf16.msra.mxu0 %v394_v7  ;;  %v21_v9 = vld [vmem:[%s567_s0 + $0x48] sm:$0xff]  ;;  %v22_v11 = vld [vmem:[%s567_s0 + $0x50] sm:$0xff]  ;;  %v15_v12 = vld [vmem:[%s567_s0 + $0x18] sm:$0xff] }
   0xa   :  { %401 = vmatpush3.bf16.msra.mxu1 %v394_v7  ;;  %v23_v13 = vld [vmem:[%s567_s0 + $0x58] sm:$0xff]  ;;  %v16_v14 = vld [vmem:[%s567_s0 + $0x20] sm:$0xff]  ;;  %v17_v16 = vld [vmem:[%s567_s0 + $0x28] sm:$0xff] }
   0xb   :  { %v24_v15 = vld [vmem:[%s567_s0 + $0x60] sm:$0xff]  ;;  %v25_v17 = vld [vmem:[%s567_s0 + $0x68] sm:$0xff]  ;;  %v18_v18 = vld [vmem:[%s567_s0 + $0x30] sm:$0xff] }
   0xc   :  { %367 = vmatmul.mubr.msk.f32.vlgmr.msra.gmra.mrb[0].mxu0 %vm32_vm0, %v13_v8  ;;  %v26_v19 = vld [vmem:[%s567_s0 + $0x70] sm:$0xff]  ;;  %v19_v20 = vld [vmem:[%s567_s0 + $0x38] sm:$0xff] }
   0xd   :  { %379 = vmatmul.mubr.msk.f32.vlgmr.msra.gmra.mrb[0].mxu1 %vm32_vm0, %v21_v9  ;;  %369 = vmatprep.mubr.msk.f32.mxu0 %vm32_vm0, %v14_v10  ;;  %v27_v21 = vld [vmem:[%s567_s0 + $0x78] sm:$0xff]  ;;  %s461_s0 = smov [#allocation2]  }
   0xe   :  { %381 = vmatprep.mubr.msk.f32.mxu1 %vm32_vm0, %v22_v11  ;;  %s311_s20 = sshll.u32 %s461_s0, 4  ;;  %s312_s20 = int_to_ptr.vmem [resolvable:$true] %s311_s20 }
   0xf   :  { %s437_s1 = scalar_lea.vmem %s312_s20, 2048  ;;  %p442_p1 = scmp.lt.s32.totalorder %s312_s20, %s312_s20 }
  0x10   :  { %370 = vmatmul.mubr.msk.f32.gmra.mrb[2].mxu0 %vm32_vm0, %v15_v12  ;;  %p438_p0 = scmp.ne.s32.totalorder %s312_s20, %s437_s1  ;;  %p443_p2 = scmp.lt.s32.totalorder %s437_s1, %s437_s1 }
  0x11   :  { %382 = vmatmul.mubr.msk.f32.gmra.mrb[2].mxu1 %vm32_vm0, %v23_v13  ;;  %372 = vmatprep.mubr.msk.f32.mxu0 %vm32_vm0, %v16_v14 }
  0x12   :  { %384 = vmatprep.mubr.msk.f32.mxu1 %vm32_vm0, %v24_v15  ;;  %p444_p3 = por %p443_p2, %p442_p1 }
  0x14   :  { %373 = vmatmul.mubr.msk.f32.gmra.mrb[4].mxu0 %vm32_vm0, %v17_v16  ;;  %p445_p4 = pnand %p444_p3, %p438_p0 }
  0x15   :  { %385 = vmatmul.mubr.msk.f32.gmra.mrb[4].mxu1 %vm32_vm0, %v25_v17  ;;  %375 = vmatprep.mubr.msk.f32.mxu0 %vm32_vm0, %v18_v18 }
  0x16   :  { %387 = vmatprep.mubr.msk.f32.mxu1 %vm32_vm0, %v26_v19 }
  0x18   :  { %376 = vmatmul.mubr.msk.f32.gmra.mrb[6].mxu0 %vm32_vm0, %v19_v20 }
  0x19   :  { %388 = vmatmul.mubr.msk.f32.gmra.mrb[6].mxu1 %vm32_vm0, %v27_v21 }
  0xdf   :  { %v368_v22 = vpop.f32.mrb[0].mxu0 }
  0xe0   :  { %v380_v23 = vpop.f32.mrb[0].mxu1  ;;  %v227_v24 = vmul.f32 0.5, %v368_v22  ;;  %v147_v26 = vpop.f32.mrb[1].mxu0 }
  0xe1   :  { %v235_v25 = vmul.f32 0.5, %v380_v23  ;;  %v187_v27 = vpop.f32.mrb[1].mxu1  ;;  %v226_v28 = vmul.f32 0.5, %v147_v26 }
  0xe2   :  { %v234_v29 = vmul.f32 0.5, %v187_v27  ;;  %405 = vtanh.f32 %v227_v24 }
  0xe3   :  { %407 = vtanh.f32 %v235_v25  ;;  %v371_v30 = vpop.f32.mrb[2].mxu0 }
  0xe4   :  { %v383_v31 = vpop.f32.mrb[2].mxu1  ;;  %409 = vtanh.f32 %v226_v28  ;;  %v229_v32 = vmul.f32 0.5, %v371_v30  ;;  %v157_v34 = vpop.f32.mrb[3].mxu0 }
  0xe5   :  { %v237_v33 = vmul.f32 0.5, %v383_v31  ;;  %v197_v35 = vpop.f32.mrb[3].mxu1  ;;  %411 = vtanh.f32 %v234_v29  ;;  %v228_v36 = vmul.f32 0.5, %v157_v34 }
  0xe6   :  { %v236_v37 = vmul.f32 0.5, %v197_v35  ;;  %413 = vtanh.f32 %v229_v32 }
  0xe7   :  { %415 = vtanh.f32 %v237_v33  ;;  %v374_v38 = vpop.f32.mrb[4].mxu0 }
  0xe8   :  { %v386_v39 = vpop.f32.mrb[4].mxu1  ;;  %417 = vtanh.f32 %v228_v36  ;;  %v231_v40 = vmul.f32 0.5, %v374_v38  ;;  %v167_v42 = vpop.f32.mrb[5].mxu0 }
  0xe9   :  { %v239_v41 = vmul.f32 0.5, %v386_v39  ;;  %v207_v43 = vpop.f32.mrb[5].mxu1  ;;  %419 = vtanh.f32 %v236_v37  ;;  %v230_v44 = vmul.f32 0.5, %v167_v42 }
  0xea   :  { %v238_v45 = vmul.f32 0.5, %v207_v43  ;;  %421 = vtanh.f32 %v231_v40 }
  0xeb   :  { %423 = vtanh.f32 %v239_v41  ;;  %v377_v46 = vpop.f32.mrb[6].mxu0 }
  0xec   :  { %v389_v47 = vpop.f32.mrb[6].mxu1  ;;  %v406_v48 = vpop.eup %405  ;;  %425 = vtanh.f32 %v230_v44  ;;  %v233_v49 = vmul.f32 0.5, %v377_v46 }
  0xed   :  { %v241_v50 = vmul.f32 0.5, %v389_v47  ;;  %v177_v51 = vpop.f32.mrb[7].mxu0  ;;  %v217_v52 = vpop.f32.mrb[7].mxu1  ;;  %v259_v54 = vmul.f32 0.5, %v406_v48  ;;  %427 = vtanh.f32 %v238_v45 }
  0xee   :  { %v408_v53 = vpop.eup %407  ;;  %v232_v55 = vmul.f32 0.5, %v177_v51  ;;  %v240_v56 = vmul.f32 0.5, %v217_v52  ;;  %429 = vtanh.f32 %v233_v49 }
  0xef   :  { %v410_v57 = vpop.eup %409  ;;  %v267_v58 = vmul.f32 0.5, %v408_v53  ;;  %v275_v60 = vadd.f32 0.5, %v259_v54  ;;  %431 = vtanh.f32 %v241_v50 }
  0xf0   :  { %v412_v59 = vpop.eup %411  ;;  %v258_v61 = vmul.f32 0.5, %v410_v57  ;;  %433 = vtanh.f32 %v232_v55 }
  0xf1   :  { %v414_v62 = vpop.eup %413  ;;  %v283_v63 = vadd.f32 0.5, %v267_v58  ;;  %v266_v0 = vmul.f32 0.5, %v412_v59  ;;  %291 = vst [vmem:[#allocation2 + $0x8] sm:$0xff] %v275_v60  ;;  %435 = vtanh.f32 %v240_v56 }
  0xf2   :  { %v416_v1 = vpop.eup %415  ;;  %v274_v2 = vadd.f32 0.5, %v258_v61  ;;  %v261_v3 = vmul.f32 0.5, %v414_v62 }
  0xf3   :  { %v418_v4 = vpop.eup %417  ;;  %299 = vst [vmem:[#allocation2 + $0x48] sm:$0xff] %v283_v63  ;;  %v282_v5 = vadd.f32 0.5, %v266_v0  ;;  %v269_v6 = vmul.f32 0.5, %v416_v1 }
  0xf4   :  { %v420_v7 = vpop.eup %419  ;;  %290 = vst [vmem:[#allocation2] sm:$0xff] %v274_v2  ;;  %v277_v8 = vadd.f32 0.5, %v261_v3  ;;  %v260_v9 = vmul.f32 0.5, %v418_v4 }
  0xf5   :  { %v422_v10 = vpop.eup %421  ;;  %298 = vst [vmem:[#allocation2 + $0x40] sm:$0xff] %v282_v5  ;;  %v285_v11 = vadd.f32 0.5, %v269_v6  ;;  %v268_v12 = vmul.f32 0.5, %v420_v7 }
  0xf6   :  { %v424_v13 = vpop.eup %423  ;;  %293 = vst [vmem:[#allocation2 + $0x18] sm:$0xff] %v277_v8  ;;  %v276_v14 = vadd.f32 0.5, %v260_v9  ;;  %v263_v15 = vmul.f32 0.5, %v422_v10 }
  0xf7   :  { %v426_v16 = vpop.eup %425  ;;  %301 = vst [vmem:[#allocation2 + $0x58] sm:$0xff] %v285_v11  ;;  %v284_v17 = vadd.f32 0.5, %v268_v12  ;;  %v271_v18 = vmul.f32 0.5, %v424_v13 }
  0xf8   :  { %v428_v19 = vpop.eup %427  ;;  %292 = vst [vmem:[#allocation2 + $0x10] sm:$0xff] %v276_v14  ;;  %v279_v20 = vadd.f32 0.5, %v263_v15  ;;  %v262_v21 = vmul.f32 0.5, %v426_v16 }
  0xf9   :  { %v430_v22 = vpop.eup %429  ;;  %300 = vst [vmem:[#allocation2 + $0x50] sm:$0xff] %v284_v17  ;;  %v287_v23 = vadd.f32 0.5, %v271_v18  ;;  %v270_v24 = vmul.f32 0.5, %v428_v19 }
  0xfa   :  { %v432_v25 = vpop.eup %431  ;;  %295 = vst [vmem:[#allocation2 + $0x28] sm:$0xff] %v279_v20  ;;  %v278_v26 = vadd.f32 0.5, %v262_v21  ;;  %v265_v27 = vmul.f32 0.5, %v430_v22 }
  0xfb   :  { %v434_v28 = vpop.eup %433  ;;  %303 = vst [vmem:[#allocation2 + $0x68] sm:$0xff] %v287_v23  ;;  %v286_v29 = vadd.f32 0.5, %v270_v24  ;;  %v273_v30 = vmul.f32 0.5, %v432_v25 }
  0xfc   :  { %v436_v31 = vpop.eup %435  ;;  %294 = vst [vmem:[#allocation2 + $0x20] sm:$0xff] %v278_v26  ;;  %v281_v32 = vadd.f32 0.5, %v265_v27  ;;  %v264_v33 = vmul.f32 0.5, %v434_v28 }
  0xfd   :  { %302 = vst [vmem:[#allocation2 + $0x60] sm:$0xff] %v286_v29  ;;  %v289_v34 = vadd.f32 0.5, %v273_v30  ;;  %v272_v35 = vmul.f32 0.5, %v436_v31 }
  0xfe   :  { %297 = vst [vmem:[#allocation2 + $0x38] sm:$0xff] %v281_v32  ;;  %v280_v36 = vadd.f32 0.5, %v264_v33 }
  0xff   :  { %305 = vst [vmem:[#allocation2 + $0x78] sm:$0xff] %v289_v34  ;;  %v288_v37 = vadd.f32 0.5, %v272_v35 }
 0x100   :  { %296 = vst [vmem:[#allocation2 + $0x30] sm:$0xff] %v280_v36 }
 0x101   :  { %304 = vst [vmem:[#allocation2 + $0x70] sm:$0xff] %v288_v37 }
 0x102   :  { %448 = shalt.err (!%p445_p4)
}
 0x103   :  { %s449_s23 = scalar_lea.hbm %s569_s2, 2048 }
 0x104   :  { %p450_p5 = scmp.ne.s32.totalorder %s569_s2, %s449_s23  ;;  %p453_p6 = scmp.lt.u32.totalorder %s449_s23, %s569_s2 }
 0x106   :  { %p455_p7 = pnand %p453_p6, %p450_p5 }
 0x108   :  { %458 = shalt.err (!%p455_p7)
}
 0x109   :  { %s462_s28 = smov 128   ;;  %s463_s29 = smov 8  }
 0x10a   :  { %317 = dma.vmem_to_hbm [thread:$0]  %s312_s20, 2048, %s569_s2, [#allocation3], %s462_s28, %s462_s28, %s463_s29  }
 0x10b   :  { %459 = dma.done.wait [#allocation3], 2048  }
 0x10c   :  { %460 = vsyncadd [#allocation3], 4294965248 }
 0x10d   :  { %321 = vsyncpa [#allocation3], 1 }

</bundles_post_ra>
